<compile_context>
chip_gen: v6e
topology: v6e:2x2x1
jax: 0.10.0
libtpu: 0.0.40
codegen_flags: <defaults>
</compile_context>

<pallas_src>
import functools

import jax
import jax.numpy as jnp
from jax.experimental import pallas as pl
from jax.experimental.pallas import tpu as pltpu


def _boxcar_kernel(m_ref, kii_ref, kjj_ref, x_ref, o_ref, *,
                   half_k, ch, g, g_tile):
    # m_ref  : SMEM (S*G*4,) f32   -- flat box coordinates
    # kii_ref: VMEM (1, N)  f32    -- (0.5*k) * row index i of each flat pixel
    # kjj_ref: VMEM (1, N)  f32    -- (0.5*k) * col index j of each flat pixel
    # x_ref  : VMEM block (1, CH, N)
    # o_ref  : VMEM block (1, g_tile*CH, N)
    si = pl.program_id(0)
    gt = pl.program_id(1)

    kii = kii_ref[...]                                  # (1, N) f32
    kjj = kjj_ref[...]                                  # (1, N) f32

    # f32 compute path; cast once at the store.  The 0.25 from the
    # tanh-based sigmoid-difference identity is folded in here once.
    xq = x_ref[0].astype(jnp.float32) * jnp.float32(0.25)   # (CH, N)

    # g_tile is small and static: unrolled loop, one lane-dense store per box.
    for bi in range(g_tile):
        base = (si * g + gt * g_tile + bi) * 4
        # scalar-unit scaling of the box coordinates (hoisted off the VPU)
        a = m_ref[base + 0] * half_k                    # min along dim1 (rows)
        b = m_ref[base + 1] * half_k                    # min along dim2 (cols)
        c = m_ref[base + 2] * half_k                    # max along dim1 (rows)
        d = m_ref[base + 3] * half_k                    # max along dim2 (cols)

        # sigmoid(k z1) - sigmoid(k z2) = 0.5*(tanh(k z1/2) - tanh(k z2/2));
        # the two 0.5 factors are the 0.25 already folded into xq.
        mask = (jnp.tanh(kii - a) - jnp.tanh(kii - c)) * \
               (jnp.tanh(kjj - b) - jnp.tanh(kjj - d))  # (1, N) f32

        o_ref[0, pl.ds(bi * ch, ch)] = (xq * mask).astype(o_ref.dtype)


def _pick_g_tile(g, ch, n_pad, out_itemsize, x_itemsize, budget_bytes):
    """Largest divisor of g whose double-buffered blocks fit the VMEM budget."""
    best = 1
    for cand in range(1, g + 1):
        if g % cand:
            continue
        sub_pad = -(-(cand * ch) // 8) * 8              # sublane padding of out block
        ch_pad = -(-ch // 8) * 8
        vmem = (2 * sub_pad * n_pad * out_itemsize      # double-buffered output block
                + 2 * ch_pad * n_pad * x_itemsize       # double-buffered x block
                + 2 * 2 * n_pad * 4)                    # kii / kjj
        if vmem <= budget_bytes:
            best = cand
    return best


def boxcar_auto(x, m, k=0.1):
    """x: (S, CH, DIM1, DIM2); m: (S, G, 4) -> (S, G, CH, DIM1, DIM2)."""
    s, ch, dim1, dim2 = x.shape
    g = m.shape[1]
    n = dim1 * dim2
    n_pad = -(-n // 128) * 128                          # lane-dense, unmasked stores

    x_flat = x.reshape(s, ch, n)
    if n_pad != n:
        x_flat = jnp.pad(x_flat, ((0, 0), (0, 0), (0, n_pad - n)))

    m_flat = m.reshape(s * g * 4).astype(jnp.float32)   # 1-D SMEM layout

    # Pre-scaled flat-pixel coordinates: kii = (0.5*k)*i, kjj = (0.5*k)*j.
    half_k = 0.5 * float(k)
    p = jnp.arange(n_pad, dtype=jnp.int32)
    kii = (half_k * (p // dim2).astype(jnp.float32)).reshape(1, n_pad)
    kjj = (half_k * (p % dim2).astype(jnp.float32)).reshape(1, n_pad)

    # Tile g so the blocks fit a conservative cross-chip VMEM budget.
    g_tile = _pick_g_tile(g, ch, n_pad,
                          out_itemsize=jnp.dtype(x.dtype).itemsize,
                          x_itemsize=jnp.dtype(x.dtype).itemsize,
                          budget_bytes=24 * 1024 * 1024)

    kernel = functools.partial(_boxcar_kernel, half_k=half_k, ch=ch,
                               g=g, g_tile=g_tile)

    out_flat = pl.pallas_call(
        kernel,
        out_shape=jax.ShapeDtypeStruct((s, g * ch, n_pad), x.dtype),
        grid=(s, g // g_tile),
        in_specs=[
            pl.BlockSpec(memory_space=pltpu.MemorySpace.SMEM),        # m scalars
            pl.BlockSpec((1, n_pad), lambda si, gi: (0, 0)),          # kii
            pl.BlockSpec((1, n_pad), lambda si, gi: (0, 0)),          # kjj
            # x index_map ignores gi -> x slab stays resident across g steps
            pl.BlockSpec((1, ch, n_pad), lambda si, gi: (si, 0, 0)),  # x slab
        ],
        out_specs=pl.BlockSpec((1, g_tile * ch, n_pad),
                               lambda si, gi: (si, gi, 0)),
        compiler_params=pltpu.CompilerParams(
            dimension_semantics=("parallel", "parallel"),
            vmem_limit_bytes=32 * 1024 * 1024),
    )(m_flat, kii, kjj, x_flat)

    return out_flat[:, :, :n].reshape(s, g, ch, dim1, dim2)


def boxcar_auto_ref(x, m, k=0.1):
    """Pure-JAX reference (mirrors the PyTorch forward), exact f32 math."""
    s, ch, dim1, dim2 = x.shape
    f1 = jnp.arange(dim1, dtype=jnp.float32).reshape(1, 1, 1, dim1, 1)
    f2 = jnp.arange(dim2, dtype=jnp.float32).reshape(1, 1, 1, 1, dim2)

    def logistic(z):
        return 1.0 / (1.0 + jnp.exp(-k * z))

    m = m.astype(jnp.float32)
    m1 = logistic(f1 - m[:, :, 0][:, :, None, None, None])
    m2 = logistic(f1 - m[:, :, 2][:, :, None, None, None])
    m3 = logistic(f2 - m[:, :, 1][:, :, None, None, None])
    m4 = logistic(f2 - m[:, :, 3][:, :, None, None, None])
    M = (m1 - m2) * (m3 - m4)                       # (S, G, 1, DIM1, DIM2)
    return x[:, None].astype(jnp.float32) * M       # (S, G, CH, DIM1, DIM2)


if __name__ == "__main__":
    S, G, CH, DIM1, DIM2 = 2, 3, 4, 16, 16
    K = 0.1

    key = jax.random.PRNGKey(0)
    kx, km = jax.random.split(key)
    x = jax.random.normal(kx, (S, CH, DIM1, DIM2), dtype=jnp.float32)
    # box coordinates roughly inside the image
    m = jax.random.uniform(km, (S, G, 4), dtype=jnp.float32,
                           minval=0.0, maxval=float(DIM1 - 1))

    out = boxcar_auto(x, m, k=K)
    out = jax.block_until_ready(out)

    ref = boxcar_auto_ref(x, m, k=K)
    assert out.shape == (S, G, CH, DIM1, DIM2)
    # tanh-based formulation + f32 compute: tolerance back at f32 level
    assert jnp.allclose(out, ref, atol=1e-4, rtol=1e-4), \
        float(jnp.max(jnp.abs(out - ref)))

    print("KERNEL_OK")
</pallas_src>

<mosaic_0001>
module attributes {stable_mosaic.version = 11 : i64} {
  func.func @_boxcar_kernel(%arg0: i32, %arg1: i32, %arg2: memref<24xf32, #tpu.memory_space<smem>>, %arg3: memref<1x256xf32, #tpu.memory_space<vmem>>, %arg4: memref<1x256xf32, #tpu.memory_space<vmem>>, %arg5: memref<1x4x256xf32, #tpu.memory_space<vmem>>, %arg6: memref<1x12x256xf32, #tpu.memory_space<vmem>>) attributes {dimension_semantics = [#tpu.dimension_semantics<parallel>, #tpu.dimension_semantics<parallel>], iteration_bounds = array<i64: 2, 1>, scalar_prefetch = 0 : i64, scratch_operands = 0 : i64, tpu.core_type = #tpu.core_type<tc>, window_params = [{transform_indices = @transform_0, window_bounds = array<i64: 24>}, {pipeline_mode = #tpu.pipeline_mode<synchronous>, transform_indices = @transform_1, window_bounds = array<i64: 1, 256>}, {pipeline_mode = #tpu.pipeline_mode<synchronous>, transform_indices = @transform_2, window_bounds = array<i64: 1, 256>}, {transform_indices = @transform_3, window_bounds = array<i64: 1, 4, 256>}, {transform_indices = @transform_4, window_bounds = array<i64: 1, 12, 256>}]} {
    %c0 = arith.constant 0 : index
    %c0_0 = arith.constant 0 : index
    %0 = vector.load %arg3[%c0, %c0_0] : memref<1x256xf32, #tpu.memory_space<vmem>>, vector<1x256xf32>
    %c0_1 = arith.constant 0 : index
    %c0_2 = arith.constant 0 : index
    %1 = vector.load %arg4[%c0_1, %c0_2] : memref<1x256xf32, #tpu.memory_space<vmem>>, vector<1x256xf32>
    %c0_3 = arith.constant 0 : index
    %c0_4 = arith.constant 0 : index
    %c0_5 = arith.constant 0 : index
    %2 = vector.load %arg5[%c0_3, %c0_4, %c0_5] : memref<1x4x256xf32, #tpu.memory_space<vmem>>, vector<1x4x256xf32>
    %3 = vector.shape_cast %2 : vector<1x4x256xf32> to vector<4x256xf32>
    %cst = arith.constant 2.500000e-01 : f32
    %4 = vector.broadcast %cst : f32 to vector<4x256xf32>
    %5 = arith.mulf %3, %4 : vector<4x256xf32>
    %c3_i32 = arith.constant 3 : i32
    %6 = arith.muli %arg0, %c3_i32 : i32
    %c3_i32_6 = arith.constant 3 : i32
    %7 = arith.muli %arg1, %c3_i32_6 : i32
    %8 = arith.addi %6, %7 : i32
    %c0_i32 = arith.constant 0 : i32
    %9 = arith.addi %8, %c0_i32 : i32
    %c4_i32 = arith.constant 4 : i32
    %10 = arith.muli %9, %c4_i32 : i32
    %c0_i32_7 = arith.constant 0 : i32
    %11 = arith.addi %10, %c0_i32_7 : i32
    %12 = arith.index_cast %11 : i32 to index
    %13 = memref.load %arg2[%12] : memref<24xf32, #tpu.memory_space<smem>>
    %cst_8 = arith.constant 5.000000e-02 : f32
    %14 = arith.mulf %13, %cst_8 : f32
    %c1_i32 = arith.constant 1 : i32
    %15 = arith.addi %10, %c1_i32 : i32
    %16 = arith.index_cast %15 : i32 to index
    %17 = memref.load %arg2[%16] : memref<24xf32, #tpu.memory_space<smem>>
    %cst_9 = arith.constant 5.000000e-02 : f32
    %18 = arith.mulf %17, %cst_9 : f32
    %c2_i32 = arith.constant 2 : i32
    %19 = arith.addi %10, %c2_i32 : i32
    %20 = arith.index_cast %19 : i32 to index
    %21 = memref.load %arg2[%20] : memref<24xf32, #tpu.memory_space<smem>>
    %cst_10 = arith.constant 5.000000e-02 : f32
    %22 = arith.mulf %21, %cst_10 : f32
    %c3_i32_11 = arith.constant 3 : i32
    %23 = arith.addi %10, %c3_i32_11 : i32
    %24 = arith.index_cast %23 : i32 to index
    %25 = memref.load %arg2[%24] : memref<24xf32, #tpu.memory_space<smem>>
    %cst_12 = arith.constant 5.000000e-02 : f32
    %26 = arith.mulf %25, %cst_12 : f32
    %27 = vector.broadcast %14 : f32 to vector<1x256xf32>
    %28 = arith.subf %0, %27 : vector<1x256xf32>
    %29 = math.tanh %28 : vector<1x256xf32>
    %30 = vector.broadcast %22 : f32 to vector<1x256xf32>
    %31 = arith.subf %0, %30 : vector<1x256xf32>
    %32 = math.tanh %31 : vector<1x256xf32>
    %33 = arith.subf %29, %32 : vector<1x256xf32>
    %34 = vector.broadcast %18 : f32 to vector<1x256xf32>
    %35 = arith.subf %1, %34 : vector<1x256xf32>
    %36 = math.tanh %35 : vector<1x256xf32>
    %37 = vector.broadcast %26 : f32 to vector<1x256xf32>
    %38 = arith.subf %1, %37 : vector<1x256xf32>
    %39 = math.tanh %38 : vector<1x256xf32>
    %40 = arith.subf %36, %39 : vector<1x256xf32>
    %41 = arith.mulf %33, %40 : vector<1x256xf32>
    %42 = vector.broadcast %41 : vector<1x256xf32> to vector<4x256xf32>
    %43 = arith.mulf %5, %42 : vector<4x256xf32>
    %c0_13 = arith.constant 0 : index
    %c0_14 = arith.constant 0 : index
    %c0_15 = arith.constant 0 : index
    %44 = vector.load %arg6[%c0_13, %c0_14, %c0_15] : memref<1x12x256xf32, #tpu.memory_space<vmem>>, vector<1x4x256xf32>
    %45 = vector.shape_cast %44 : vector<1x4x256xf32> to vector<4x256xf32>
    %46 = vector.shape_cast %43 : vector<4x256xf32> to vector<1x4x256xf32>
    tpu.vector_store %arg6[%c0_13, %c0_14, %c0_15], %46 {strides = array<i32>} : memref<1x12x256xf32, #tpu.memory_space<vmem>>, vector<1x4x256xf32>,
    %c3_i32_16 = arith.constant 3 : i32
    %47 = arith.muli %arg0, %c3_i32_16 : i32
    %c3_i32_17 = arith.constant 3 : i32
    %48 = arith.muli %arg1, %c3_i32_17 : i32
    %49 = arith.addi %47, %48 : i32
    %c1_i32_18 = arith.constant 1 : i32
    %50 = arith.addi %49, %c1_i32_18 : i32
    %c4_i32_19 = arith.constant 4 : i32
    %51 = arith.muli %50, %c4_i32_19 : i32
    %c0_i32_20 = arith.constant 0 : i32
    %52 = arith.addi %51, %c0_i32_20 : i32
    %53 = arith.index_cast %52 : i32 to index
    %54 = memref.load %arg2[%53] : memref<24xf32, #tpu.memory_space<smem>>
    %cst_21 = arith.constant 5.000000e-02 : f32
    %55 = arith.mulf %54, %cst_21 : f32
    %c1_i32_22 = arith.constant 1 : i32
    %56 = arith.addi %51, %c1_i32_22 : i32
    %57 = arith.index_cast %56 : i32 to index
    %58 = memref.load %arg2[%57] : memref<24xf32, #tpu.memory_space<smem>>
    %cst_23 = arith.constant 5.000000e-02 : f32
    %59 = arith.mulf %58, %cst_23 : f32
    %c2_i32_24 = arith.constant 2 : i32
    %60 = arith.addi %51, %c2_i32_24 : i32
    %61 = arith.index_cast %60 : i32 to index
    %62 = memref.load %arg2[%61] : memref<24xf32, #tpu.memory_space<smem>>
    %cst_25 = arith.constant 5.000000e-02 : f32
    %63 = arith.mulf %62, %cst_25 : f32
    %c3_i32_26 = arith.constant 3 : i32
    %64 = arith.addi %51, %c3_i32_26 : i32
    %65 = arith.index_cast %64 : i32 to index
    %66 = memref.load %arg2[%65] : memref<24xf32, #tpu.memory_space<smem>>
    %cst_27 = arith.constant 5.000000e-02 : f32
    %67 = arith.mulf %66, %cst_27 : f32
    %68 = vector.broadcast %55 : f32 to vector<1x256xf32>
    %69 = arith.subf %0, %68 : vector<1x256xf32>
    %70 = math.tanh %69 : vector<1x256xf32>
    %71 = vector.broadcast %63 : f32 to vector<1x256xf32>
    %72 = arith.subf %0, %71 : vector<1x256xf32>
    %73 = math.tanh %72 : vector<1x256xf32>
    %74 = arith.subf %70, %73 : vector<1x256xf32>
    %75 = vector.broadcast %59 : f32 to vector<1x256xf32>
    %76 = arith.subf %1, %75 : vector<1x256xf32>
    %77 = math.tanh %76 : vector<1x256xf32>
    %78 = vector.broadcast %67 : f32 to vector<1x256xf32>
    %79 = arith.subf %1, %78 : vector<1x256xf32>
    %80 = math.tanh %79 : vector<1x256xf32>
    %81 = arith.subf %77, %80 : vector<1x256xf32>
    %82 = arith.mulf %74, %81 : vector<1x256xf32>
    %83 = vector.broadcast %82 : vector<1x256xf32> to vector<4x256xf32>
    %84 = arith.mulf %5, %83 : vector<4x256xf32>
    %c0_28 = arith.constant 0 : index
    %c4 = arith.constant 4 : index
    %c0_29 = arith.constant 0 : index
    %85 = vector.load %arg6[%c0_28, %c4, %c0_29] : memref<1x12x256xf32, #tpu.memory_space<vmem>>, vector<1x4x256xf32>
    %86 = vector.shape_cast %85 : vector<1x4x256xf32> to vector<4x256xf32>
    %87 = vector.shape_cast %84 : vector<4x256xf32> to vector<1x4x256xf32>
    tpu.vector_store %arg6[%c0_28, %c4, %c0_29], %87 {strides = array<i32>} : memref<1x12x256xf32, #tpu.memory_space<vmem>>, vector<1x4x256xf32>,
    %c3_i32_30 = arith.constant 3 : i32
    %88 = arith.muli %arg0, %c3_i32_30 : i32
    %c3_i32_31 = arith.constant 3 : i32
    %89 = arith.muli %arg1, %c3_i32_31 : i32
    %90 = arith.addi %88, %89 : i32
    %c2_i32_32 = arith.constant 2 : i32
    %91 = arith.addi %90, %c2_i32_32 : i32
    %c4_i32_33 = arith.constant 4 : i32
    %92 = arith.muli %91, %c4_i32_33 : i32
    %c0_i32_34 = arith.constant 0 : i32
    %93 = arith.addi %92, %c0_i32_34 : i32
    %94 = arith.index_cast %93 : i32 to index
    %95 = memref.load %arg2[%94] : memref<24xf32, #tpu.memory_space<smem>>
    %cst_35 = arith.constant 5.000000e-02 : f32
    %96 = arith.mulf %95, %cst_35 : f32
    %c1_i32_36 = arith.constant 1 : i32
    %97 = arith.addi %92, %c1_i32_36 : i32
    %98 = arith.index_cast %97 : i32 to index
    %99 = memref.load %arg2[%98] : memref<24xf32, #tpu.memory_space<smem>>
    %cst_37 = arith.constant 5.000000e-02 : f32
    %100 = arith.mulf %99, %cst_37 : f32
    %c2_i32_38 = arith.constant 2 : i32
    %101 = arith.addi %92, %c2_i32_38 : i32
    %102 = arith.index_cast %101 : i32 to index
    %103 = memref.load %arg2[%102] : memref<24xf32, #tpu.memory_space<smem>>
    %cst_39 = arith.constant 5.000000e-02 : f32
    %104 = arith.mulf %103, %cst_39 : f32
    %c3_i32_40 = arith.constant 3 : i32
    %105 = arith.addi %92, %c3_i32_40 : i32
    %106 = arith.index_cast %105 : i32 to index
    %107 = memref.load %arg2[%106] : memref<24xf32, #tpu.memory_space<smem>>
    %cst_41 = arith.constant 5.000000e-02 : f32
    %108 = arith.mulf %107, %cst_41 : f32
    %109 = vector.broadcast %96 : f32 to vector<1x256xf32>
    %110 = arith.subf %0, %109 : vector<1x256xf32>
    %111 = math.tanh %110 : vector<1x256xf32>
    %112 = vector.broadcast %104 : f32 to vector<1x256xf32>
    %113 = arith.subf %0, %112 : vector<1x256xf32>
    %114 = math.tanh %113 : vector<1x256xf32>
    %115 = arith.subf %111, %114 : vector<1x256xf32>
    %116 = vector.broadcast %100 : f32 to vector<1x256xf32>
    %117 = arith.subf %1, %116 : vector<1x256xf32>
    %118 = math.tanh %117 : vector<1x256xf32>
    %119 = vector.broadcast %108 : f32 to vector<1x256xf32>
    %120 = arith.subf %1, %119 : vector<1x256xf32>
    %121 = math.tanh %120 : vector<1x256xf32>
    %122 = arith.subf %118, %121 : vector<1x256xf32>
    %123 = arith.mulf %115, %122 : vector<1x256xf32>
    %124 = vector.broadcast %123 : vector<1x256xf32> to vector<4x256xf32>
    %125 = arith.mulf %5, %124 : vector<4x256xf32>
    %c0_42 = arith.constant 0 : index
    %c8 = arith.constant 8 : index
    %c0_43 = arith.constant 0 : index
    %126 = vector.load %arg6[%c0_42, %c8, %c0_43] : memref<1x12x256xf32, #tpu.memory_space<vmem>>, vector<1x4x256xf32>
    %127 = vector.shape_cast %126 : vector<1x4x256xf32> to vector<4x256xf32>
    %128 = vector.shape_cast %125 : vector<4x256xf32> to vector<1x4x256xf32>
    tpu.vector_store %arg6[%c0_42, %c8, %c0_43], %128 {strides = array<i32>} : memref<1x12x256xf32, #tpu.memory_space<vmem>>, vector<1x4x256xf32>,
    return
  }
  func.func @transform_0(%arg0: i32, %arg1: i32) -> i32 {
    %c0_i32 = arith.constant 0 : i32
    %c0_i32_0 = arith.constant 0 : i32
    return %c0_i32 : i32
  }
  func.func @transform_1(%arg0: i32, %arg1: i32) -> (i32, i32) {
    %c0_i32 = arith.constant 0 : i32
    %c0_i32_0 = arith.constant 0 : i32
    %c0_i32_1 = arith.constant 0 : i32
    return %c0_i32, %c0_i32_0 : i32, i32
  }
  func.func @transform_2(%arg0: i32, %arg1: i32) -> (i32, i32) {
    %c0_i32 = arith.constant 0 : i32
    %c0_i32_0 = arith.constant 0 : i32
    %c0_i32_1 = arith.constant 0 : i32
    return %c0_i32, %c0_i32_0 : i32, i32
  }
  func.func @transform_3(%arg0: i32, %arg1: i32) -> (i32, i32, i32) {
    %c0_i32 = arith.constant 0 : i32
    %c0_i32_0 = arith.constant 0 : i32
    %c0_i32_1 = arith.constant 0 : i32
    return %arg0, %c0_i32, %c0_i32_0 : i32, i32, i32
  }
  func.func @transform_4(%arg0: i32, %arg1: i32) -> (i32, i32, i32) {
    %c0_i32 = arith.constant 0 : i32
    %c0_i32_0 = arith.constant 0 : i32
    return %arg0, %arg1, %c0_i32 : i32, i32, i32
  }
}

</mosaic_0001>

<bundles_post_ra>
// kernel: tpu_custom_call.1
= control target key start
LH: loop header
LB: loop body
LE: loop exit
PB: predicated region body
PF: predicated region fallthrough
CT: control target
= control target key end

     0   :  { %9 = vsyncpa [#allocation4], 0  ;;  %s983_s0 = inlined_call_operand.hbm [shape: f32[24], index: 0, kind: input, shape index: {}]   ;;  %s984_s1 = inlined_call_operand.hbm [shape: f32[1,256], index: 1, kind: input, shape index: {}]   ;;  %s985_s2 = inlined_call_operand.vmem [shape: f32[1,256], index: 2, kind: input, shape index: {}]   ;;  %s986_s3 = inlined_call_operand.hbm [shape: f32[2,4,256], index: 3, kind: input, shape index: {}]   ;;  %s987_s4 = inlined_call_operand.vmem [shape: f32[2,12,256], index: 4, kind: output, shape index: {}]  }
   0x1   :  { %10 = vsyncpa [#allocation3], 0 }
   0x2   :  { %11 = vsyncpa [#allocation7], 0 }
   0x3   :  { %13 = vsyncpa [#allocation7 + $0x1], 0  ;;  %s810_s15 = smov 0   ;;  %s812_s16 = smov 0  }
   0x4   :  { %s814_s17 = smov 0   ;;  %s816_s18 = smov 0  }
   0x5   :  { %s818_s19 = smov 0   ;;  %s820_s20 = smov 0  }
   0x6 LB: > { %s529_s21 = sadd.s32 4294967295, %s780_s20   ;;  %p114_p0 = scmp.ne.s32.totalorder %s764_s16, %s760_s15  ;;  %s780_s20 = sphi %s820_s20, %s19_s20   ;;  %s776_s19 = sphi %s818_s19, %s999_s19   ;;  %s772_s18 = sphi %s816_s18, %s998_s18   ;;  %s768_s17 = sphi %s814_s17, %s997_s17   ;;  %s764_s16 = sphi %s812_s16, %s996_s16   ;;  %s760_s15 = sphi %s810_s15, %s995_s15  }
   0x7   : > { %p840_p1 = scmp.eq.s32.totalorder %s529_s21, 0  ;;  %p531_p2 = scmp.ge.s32.totalorder %s780_s20, 1 }
   0x8   : > { %p153_p3 = scmp.lt.s32.totalorder %s780_s20, 3  ;;  %s782_s25 = smov [#allocation5]  }
   0x9   : > { %p848_p4 = por %p840_p1, %p114_p0  ;;  %s175_s26 = sshll.u32 %s782_s25, 4  ;;  %s176_s26 = int_to_ptr.vmem [resolvable:$true] %s175_s26 }
   0xa   : > { %p852_p5 = pnand %p531_p2, %p153_p3  ;;  %s31_s28 = sadd.s32 1, %s776_s19 }
   0xb   : > { %p865_p8 = scmp.ge.s32.totalorder %s31_s28, 2  ;;  %s783_s30 = smov [#allocation2]  }
   0xc   : > { %p567_p6 = pneg %p852_p5  ;;  %s679_s7 = scalar_lea.vmem %s176_s26, 32 }
   0xd   : > { %p680_p10 = scmp.ne.s32.totalorder %s176_s26, %s679_s7  ;;  %p687_p13 = scmp.lt.s32.totalorder %s176_s26, %s176_s26 }
   0xe   : > { %p860_p7 = pnand %p567_p6, %p840_p1  ;;  %p688_p0 = scmp.lt.s32.totalorder %s679_s7, %s679_s7 }
  0x10   : > { %570 = dma.hbm_to_smem (!%p860_p7), %s983_s0, 16, %s783_s30, [#allocation4]  }
  0x11   : > { %p670_p9 = pneg %p860_p7  ;;  %p689_p2 = por %p688_p0, %p687_p13 }
  0x13   : > { %p682_p11 = pnand %p680_p10, %p670_p9 }
  0x15   : > { %p683_p12 = pneg %p682_p11 }
  0x17   : > { %p690_p3 = pnand %p689_p2, %p683_p12 }
  0x19   : > { %693 = shalt.err (!%p690_p3)
}
  0x1a   : > { %573 = dma.hbm_to_vmem [thread:$0]  (!%p860_p7), %s984_s1, 32, %s176_s26, [#allocation3]  }
  0x1b   : > { %s1001_s28 = smov (%p865_p8, %s31_s28), 0  ;;  %s101_s10 = sadd.s32 1, %s768_s17 }
  0x1c   : > { %p108_p6 = scmp.ne.s32.totalorder %s768_s17, %s764_s16  ;;  %s98_s11 = ssub.s32 %s776_s19, %s1001_s28 }
  0x1d   : > { %p109_p9 = scmp.eq.s32.totalorder %s780_s20, 0  ;;  %p99_p10 = scmp.eq.s32.totalorder %s98_s11, 0 }
  0x1e   : > { %p580_p11 = scmp.lt.s32.totalorder %s780_s20, 2  ;;  %s189_s12 = sand.u32 1, %s768_s17  }
  0x1f   : > { %p110_p12 = por %p109_p9, %p108_p6  ;;  %s535_s14 = sshll.u32 %s189_s12, 3 }
  0x20   : > { %s894_s13 = scalar_select %p99_p10, %s768_s17, %s101_s10  }
  0x21   : > { %s549_s15 = sshll.u32 %s776_s19, 7  ;;  %s193_s27 = scalar_lea.vmem [#allocation6], %s535_s14 }
  0x22   : > { %s199_s26 = scalar_lea.hbm %s986_s3, %s549_s15  ;;  %s201_s29 = sshll.u32 %s193_s27, 4  ;;  %s202_s29 = int_to_ptr.vmem [resolvable:$true] %s201_s29 }
  0x23   : > { %p900_p7 = pnand %p580_p11, %p110_p12  ;;  %s190_s5 = scalar_lea.sflag [#allocation7], %s189_s12 }
  0x24   : > { %s707_s6 = scalar_lea.vmem %s202_s29, 128  ;;  %s784_s7 = smov [#allocation6]  }
  0x25   : > { %p696_p8 = pneg %p900_p7  ;;  %p708_p13 = scmp.ne.s32.totalorder %s202_s29, %s707_s6 }
  0x26   : > { %s712_s8 = sshll.u32 %s784_s7, 4  ;;  %s713_s8 = int_to_ptr.vmem [resolvable:$false] %s712_s8 }
  0x27   : > { %p710_p0 = pnand %p708_p13, %p696_p8  ;;  %s714_s9 = scalar_lea.vmem %s713_s8, 256 }
  0x28   : > { %p715_p3 = scmp.lt.s32.totalorder %s202_s29, %s713_s8  ;;  %p716_p6 = scmp.lt.s32.totalorder %s714_s9, %s707_s6 }
  0x29   : > { %p711_p2 = pneg %p710_p0 }
  0x2a   : > { %p717_p9 = por %p716_p6, %p715_p3 }
  0x2c   : > { %p718_p10 = pnand %p717_p9, %p711_p2 }
  0x2e   : > { %721 = shalt.err (!%p718_p10)
}
  0x2f   : > { %577 = dma.hbm_to_vmem [thread:$0]  (!%p900_p7), %s199_s26, 128, %s202_s29, %s190_s5  }
  0x30   : > { %210 = sbr.rel (%p852_p5) target bundleno = 116 (0x74), region = 36 }
  0x35   : > { %747 = dma.done.wait (%p840_p1), [#allocation4], 16  }
  0x36   : > { %749 = vsyncadd (%p840_p1), [#allocation4], 4294967280 }
  0x37   : > { %751 = dma.done.wait (%p840_p1), [#allocation3], 32  }
  0x38   : > { %753 = vsyncadd (%p840_p1), [#allocation3], 4294967264  ;;  %s220_s10 = sand.u32 1, %s764_s16  }
  0x39   : > { %s919_s11 = sshll.u32 %s220_s10, 3  ;;  %s221_s24 = scalar_lea.sflag [#allocation7], %s220_s10 }
  0x3a   : > { %755 = dma.done.wait (%p848_p4), %s221_s24, 128  }
  0x3b   : > { %757 = vsyncadd (%p848_p4), %s221_s24, 4294967168 }
  0x3c   : > { %229 = sfence }
  0x3d   : > { %s544_s14 = smul.u32 12, %s772_s18  ;;  %v927_v0 = vld [vmem:[#allocation5] sm:$0x3]  ;;  %v301_v20 = vlaneseq  ;;  %p256_p1 = scmp.lt.s32.totalorder %s772_s18, 1 }
  0x3e   : > { %v934_v1 = vld [vmem:[%s985_s2] sm:$0x3] }
  0x3f   : > { %s274_s15 = sld [smem:[#allocation2 + %s544_s14]]  ;;  %s276_s21 = sadd.s32 1, %s544_s14  ;;  %v302_v27 = vshrl.u32 %v301_v20, 7 }
  0x40   : > { %s277_s22 = sld [smem:[#allocation2 + %s276_s21]]  ;;  %s279_s25 = sadd.s32 2, %s544_s14 }
  0x41   : > { %s280_s26 = sld [smem:[#allocation2 + %s279_s25]]  ;;  %s282_s27 = sadd.s32 3, %s544_s14  ;;  %v303_v34 = vsub.s32 0, %v302_v27  ;;  %v307_v35 = vsub.s32 1, %v302_v27 }
  0x42   : > { %s283_s29 = sld [smem:[#allocation2 + %s282_s27]]  ;;  %s552_s30 = sadd.s32 4, %s544_s14 }
  0x43   : > { %s319_s5 = sld [smem:[#allocation2 + %s552_s30]]  ;;  %s321_s6 = sadd.s32 1, %s552_s30 }
  0x44   : > { %s929_s8 = sld [smem:[#allocation2 + %s321_s6]]  ;;  %s324_s24 = sadd.s32 2, %s552_s30 }
  0x45   : > { %s275_s7 = smul.f32 0.05, %s274_s15  ;;  %s936_s21 = sld [smem:[#allocation2 + %s324_s24]] }
  0x46   : > { %s278_s10 = smul.f32 0.05, %s277_s22  ;;  %s327_s25 = sadd.s32 3, %s552_s30 }
  0x47   : > { %v285_v2 = vstv %s275_s7  ;;  %s281_s27 = smul.f32 0.05, %s280_s26  ;;  %s939_s12 = sld [smem:[#allocation2 + %s327_s25]] }
  0x48   : > { %v286_v3 = vsub.f32 %v927_v0, %v285_v2  ;;  %v292_v4 = vstv %s278_s10  ;;  %s284_s15 = smul.f32 0.05, %s283_s29  ;;  %s554_s6 = sadd.s32 8, %s544_s14 }
  0x49   : > { %v293_v5 = vsub.f32 %v934_v1, %v292_v4  ;;  %v288_v6 = vstv %s281_s27  ;;  %s320_s23 = smul.f32 0.05, %s319_s5  ;;  %s942_s22 = sld [smem:[#allocation2 + %s554_s6]] }
  0x4a   : > { %633 = vtanh.f32 %v286_v3  ;;  %v289_v7 = vsub.f32 %v927_v0, %v288_v6  ;;  %v295_v8 = vstv %s284_s15  ;;  %s323_s26 = smul.f32 0.05, %s929_s8  ;;  %s366_s30 = sadd.s32 1, %s554_s6 }
  0x4b   : > { %635 = vtanh.f32 %v293_v5  ;;  %v296_v9 = vsub.f32 %v934_v1, %v295_v8  ;;  %v330_v10 = vstv %s320_s23  ;;  %s367_s29 = sld [smem:[#allocation2 + %s366_s30]]  ;;  %s369_s7 = sadd.s32 2, %s554_s6 }
  0x4c   : > { %637 = vtanh.f32 %v289_v7  ;;  %s326_s14 = smul.f32 0.05, %s936_s21  ;;  %v331_v11 = vsub.f32 %v927_v0, %v330_v10  ;;  %v337_v12 = vstv %s323_s26  ;;  %s370_s5 = sld [smem:[#allocation2 + %s369_s7]] }
  0x4d   : > { %639 = vtanh.f32 %v296_v9  ;;  %s329_s9 = smul.f32 0.05, %s939_s12  ;;  %v338_v13 = vsub.f32 %v934_v1, %v337_v12  ;;  %s372_s10 = sadd.s32 3, %s554_s6 }
  0x4e   : > { %v333_v14 = vstv %s326_s14  ;;  %s373_s8 = sld [smem:[#allocation2 + %s372_s10]]  ;;  %641 = vtanh.f32 %v331_v11  ;;  %s1003_s18 = smov (!%p256_p1, %s772_s18), 1 }
  0x4f   : > { %v334_v15 = vsub.f32 %v927_v0, %v333_v14  ;;  %v340_v16 = vstv %s329_s9  ;;  %s365_s24 = smul.f32 0.05, %s942_s22  ;;  %643 = vtanh.f32 %v338_v13  ;;  %s994_s27 = scalar_lea.vmem [#allocation6], %s919_s11 }
  0x50   : > { %v341_v17 = vsub.f32 %v934_v1, %v340_v16  ;;  %v268_v37 = vld [vmem:[%s994_s27] sm:$0xff]  ;;  %s550_s15 = sshll.u32 %s1003_s18, 5 }
  0x51   : > { %645 = vtanh.f32 %v334_v15  ;;  %s368_s21 = smul.f32 0.05, %s367_s29  ;;  %v375_v18 = vstv %s365_s24  ;;  %v269_v42 = vmul.f32 0.25, %v268_v37  ;;  %s264_s22 = scalar_lea.vmem %s987_s4, %s550_s15 }
  0x52   : > { %647 = vtanh.f32 %v341_v17  ;;  %s371_s25 = smul.f32 0.05, %s370_s5  ;;  %v376_v19 = vsub.f32 %v927_v0, %v375_v18 }
  0x53   : > { %v382_v21 = vstv %s368_s21 }
  0x54   : > { %s374_s12 = smul.f32 0.05, %s373_s8  ;;  %v378_v22 = vstv %s371_s25  ;;  %v383_v23 = vsub.f32 %v934_v1, %v382_v21  ;;  %649 = vtanh.f32 %v376_v19 }
  0x55   : > { %v379_v24 = vsub.f32 %v927_v0, %v378_v22 }
  0x56   : > { %651 = vtanh.f32 %v383_v23  ;;  %v385_v25 = vstv %s374_s12 }
  0x57   : > { %v634_v26 = vpop.eup %633  ;;  %653 = vtanh.f32 %v379_v24  ;;  %v386_v28 = vsub.f32 %v934_v1, %v385_v25 }
  0x58   : > { %v636_v29 = vpop.eup %635 }
  0x59   : > { %v638_v30 = vpop.eup %637  ;;  %655 = vtanh.f32 %v386_v28 }
  0x5a   : > { %v640_v31 = vpop.eup %639  ;;  %v291_v32 = vsub.f32 %v634_v26, %v638_v30 }
  0x5b   : > { %v298_v33 = vsub.f32 %v636_v29, %v640_v31  ;;  %v642_v36 = vpop.eup %641 }
  0x5c   : > { %v644_v38 = vpop.eup %643 }
  0x5d   : > { %v299_v39 = vmul.f32 %v298_v33, %v291_v32 }
  0x5e   : > { %v646_v40 = vpop.eup %645 }
  0x5f   : > { %v648_v41 = vpop.eup %647  ;;  %v304_v43 = vrot.slane %v299_v39, %v303_v34  ;;  %v308_v44 = vrot.slane %v299_v39, %v307_v35  ;;  %v336_v45 = vsub.f32 %v642_v36, %v646_v40 }
  0x60   : > { %v343_v46 = vsub.f32 %v644_v38, %v648_v41 }
  0x61   : > { %v309_v47 = vcombine.low %v304_v43, %v308_v44  ;;  %v650_v48 = vpop.eup %649 }
  0x62   : > { %v344_v49 = vmul.f32 %v343_v46, %v336_v45 }
  0x63   : > { %v652_v50 = vpop.eup %651  ;;  %v311_v51 = vmul.f32 %v309_v47, %v269_v42 }
  0x64   : > { %v654_v52 = vpop.eup %653  ;;  %v349_v53 = vrot.slane %v344_v49, %v303_v34  ;;  %v353_v54 = vrot.slane %v344_v49, %v307_v35 }
  0x65   : > { %315 = vst [vmem:[%s264_s22] sm:$0xf] %v311_v51  ;;  %v313_v55 = vcombine.high %v311_v51, %v311_v51  ;;  %v381_v56 = vsub.f32 %v650_v48, %v654_v52 }
  0x66   : > { %v656_v57 = vpop.eup %655  ;;  %v354_v58 = vcombine.low %v349_v53, %v353_v54 }
  0x67   : > { %316 = vst [vmem:[%s264_s22 + $0x8] sm:$0xf] %v313_v55  ;;  %v388_v59 = vsub.f32 %v652_v50, %v656_v57 }
  0x68   : > { %v356_v60 = vmul.f32 %v354_v58, %v269_v42 }
  0x69   : > { %v389_v61 = vmul.f32 %v388_v59, %v381_v56 }
  0x6a   : > { %v358_v62 = vcombine.low %v356_v60, %v356_v60  ;;  %361 = vst [vmem:[%s264_s22 + $0x8] sm:$0xf0] %v356_v60 }
  0x6b   : > { %v394_v63 = vrot.slane %v389_v61, %v303_v34  ;;  %v398_v0 = vrot.slane %v389_v61, %v307_v35 }
  0x6c   : > { %360 = vst [vmem:[%s264_s22] sm:$0xf0] %v358_v62 }
  0x6d   : > { %v399_v1 = vcombine.low %v394_v63, %v398_v0 }
  0x6f   : > { %v401_v2 = vmul.f32 %v399_v1, %v269_v42 }
  0x71   : > { %405 = vst [vmem:[%s264_s22 + $0x10] sm:$0xf] %v401_v2  ;;  %v403_v3 = vcombine.high %v401_v2, %v401_v2 }
  0x73   : > { %406 = vst [vmem:[%s264_s22 + $0x18] sm:$0xf] %v403_v3 }
  0x74 PF: > { %s19_s20 = sadd.s32 1, %s780_s20   ;;  %s995_s15 = smov %s764_s16 }
  0x75   : > { %p16_p4 = scmp.ge.s32.totalorder %s19_s20, 4   ;;  %s996_s16 = smov %s768_s17 }
  0x76   : > { %s997_s17 = smov %s894_s13  ;;  %s998_s18 = smov %s776_s19 }
  0x77   : > { %s999_s19 = smov %s1001_s28  ;;  %18 = sbr.rel (!%p16_p4) target bundleno = 6 (0x6), region = 86 }
  0x7c   :  { %439 = vsyncpa [#allocation3], 1 }
  0x7d   :  { %441 = vsyncpa [#allocation3 + $0x1], 1 }
  0x7e   :  { %442 = vsyncpa [#allocation7], 1 }
  0x7f   :  { %444 = vsyncpa [#allocation7 + $0x1], 1 }
  0x80   :  { %445 = vsyncpa [#allocation4], 1 }
  0x81   :  { %447 = vsyncpa [#allocation4 + $0x1], 1 }

</bundles_post_ra>
